<compile_context>
chip_gen: v5e
topology: v5e:2x2
jax: 0.10.0
libtpu: 0.0.40
codegen_flags: <defaults>
</compile_context>

<pallas_src>
import functools

import jax
import jax.numpy as jnp
from jax.experimental import pallas as pl
from jax.experimental.pallas import tpu as pltpu

LANE = 128
SUBLANE = 8


def _round_up(x, m):
    return (x + m - 1) // m * m


def _vmem_budget_bytes():
    """~75% of physical VMEM (v5e/v6e: 96 MiB, v7x: 48 MiB), capped at 112 MiB."""
    cap = 64 * 1024 * 1024
    try:
        cap = int(pltpu.get_tpu_info().vmem_capacity_bytes)
    except Exception:
        pass
    return max(32 * 1024 * 1024, min(cap * 3 // 4, 112 * 1024 * 1024))


def _pick_row_tile(n):
    """Largest sublane-aligned row tile with >=2 tiles and <~7% row padding."""
    n8 = _round_up(n, SUBLANE)
    candidates = (512, 256, 128, 64, 32, 16, 8)
    for t in candidates:
        if 2 * t <= n8 and (_round_up(n, t) - n) * 15 <= n:
            return t
    for t in candidates:
        if 2 * t <= n8:
            return t
    return n8  # tiny graph: single row tile


def gcn_geometry(n, d_max=LANE):
    """Shared tiling plan (the padded-A builder and the forward must agree)."""
    budget = _vmem_budget_bytes()
    tile_rows = _pick_row_tile(n)
    pn_rows = _round_up(n, tile_rows)
    pn_k = _round_up(n, LANE)

    # VMEM bookkeeping (bytes; conservative 2x buffers on every operand).
    fixed = 2 * tile_rows * d_max * 4          # output tile (f32 worst case)
    fixed += tile_rows * d_max * 4             # f32 accumulator scratch
    fixed += 2 * (1 << 20)                     # resident weights/bias + slack
    m_bytes = 2 * pn_k * d_max * 2             # resident bf16 M (XW1 / HW)
    m_resident = fixed + m_bytes + 4 * tile_rows * LANE <= budget

    avail = budget - fixed - (m_bytes if m_resident else 2 * 2048 * d_max * 2)
    if 2 * tile_rows * pn_k * 2 <= avail:
        tile_k = pn_k                          # K collapsed: 1 step per row tile
    else:
        tile_k = avail // (4 * tile_rows)      # 2 bufs * bf16 row-slab
        tile_k = max(LANE, min(2048, tile_k // LANE * LANE))
        pn_k = _round_up(n, tile_k)
    return dict(tile_rows=tile_rows, pn_rows=pn_rows, pn_k=pn_k,
                tile_k=tile_k, m_resident=m_resident, budget=budget)


# ---------------------------------------------------------------------------
# Kernels
# ---------------------------------------------------------------------------
def _m_block(m_ref, k, tile_k):
    """M may be fully VMEM-resident; slice this step's K rows if so (static no-op
    when the incoming block already matches tile_k)."""
    if m_ref.shape[0] == tile_k:
        return m_ref[...]
    return m_ref[pl.ds(pl.multiple_of(k * tile_k, tile_k), tile_k), :]


def _l1_fused_xw_kernel(a_ref, x_ref, w1_ref, b1_ref, w2_ref, o_ref, acc_ref,
                        *, tile_k):
    """HW = relu((A @ X) @ W1 + b1) @ W2   (narrow-feature layer-1 path)."""
    k = pl.program_id(1)

    @pl.when(k == 0)
    def _():
        acc_ref[...] = jnp.zeros_like(acc_ref)

    acc_ref[...] += jnp.dot(a_ref[...], _m_block(x_ref, k, tile_k),
                            preferred_element_type=jnp.float32)

    @pl.when(k == pl.num_programs(1) - 1)
    def _():
        # Epilogue matmuls are 128-wide and off the A-stream critical path;
        # keep them in f32 to preserve the accumulator's precision.
        h = jnp.dot(acc_ref[...], w1_ref[...],
                    preferred_element_type=jnp.float32)
        h = jnp.maximum(h + b1_ref[...], 0.0)
        # TODO(synk): F.dropout(h, training=True) would need pltpu.prng_* here
        # (and would forbid fusing H @ W2); eval mode is identity.
        o_ref[...] = jnp.dot(h, w2_ref[...],
                             preferred_element_type=jnp.float32
                             ).astype(o_ref.dtype)


def _l1_fused_pre_kernel(a_ref, xw_ref, b1_ref, w2_ref, o_ref, acc_ref,
                         *, tile_k):
    """HW = relu(A @ (X W1) + b1) @ W2   (wide-feature layer-1 path)."""
    k = pl.program_id(1)

    @pl.when(k == 0)
    def _():
        acc_ref[...] = jnp.zeros_like(acc_ref)

    acc_ref[...] += jnp.dot(a_ref[...], _m_block(xw_ref, k, tile_k),
                            preferred_element_type=jnp.float32)

    @pl.when(k == pl.num_programs(1) - 1)
    def _():
        h = jnp.maximum(acc_ref[...] + b1_ref[...], 0.0)
        o_ref[...] = jnp.dot(h, w2_ref[...],
                             preferred_element_type=jnp.float32
                             ).astype(o_ref.dtype)


def _l2_logsoftmax_kernel(a_ref, hw_ref, b2_ref, o_ref, *, tile_k,
                          n_valid_cols):
    """out = log_softmax(A @ HW + b2) over the first n_valid_cols lanes."""
    k = pl.program_id(1)

    @pl.when(k == 0)
    def _():
        o_ref[...] = jnp.zeros_like(o_ref)

    # Accumulate straight into the f32 output block (its block index is
    # constant across K, so it stays VMEM-resident) - no scratch needed.
    o_ref[...] += jnp.dot(a_ref[...], _m_block(hw_ref, k, tile_k),
                          preferred_element_type=jnp.float32)

    @pl.when(k == pl.num_programs(1) - 1)
    def _():
        z = o_ref[...] + b2_ref[...]
        col = jax.lax.broadcasted_iota(jnp.int32, z.shape, dimension=1)
        valid = col < n_valid_cols
        z = jnp.where(valid, z, -jnp.inf)
        mx = jnp.max(z, axis=1, keepdims=True)
        s = z - mx
        lse = jnp.log(jnp.sum(jnp.exp(s), axis=1, keepdims=True))
        o_ref[...] = jnp.where(valid, s - lse, 0.0)


def _xform_kernel(x_ref, w_ref, o_ref):
    o_ref[...] = jnp.dot(x_ref[...], w_ref[...],
                         preferred_element_type=jnp.float32).astype(o_ref.dtype)


# ---------------------------------------------------------------------------
# pallas_call wrappers
# ---------------------------------------------------------------------------
def _feature_transform(x, w, budget):
    """Y = X @ W, row-tiled (used once to precompute X @ W1 when F > hidden)."""
    pn, f = x.shape
    h = w.shape[1]
    tile = min(512, pn)
    while pn % tile:
        tile //= 2                      # pn is a multiple of 128 -> terminates
    return pl.pallas_call(
        _xform_kernel,
        out_shape=jax.ShapeDtypeStruct((pn, h), jnp.bfloat16),
        grid_spec=pltpu.PrefetchScalarGridSpec(
            num_scalar_prefetch=0,
            grid=(pn // tile,),
            in_specs=[pl.BlockSpec((tile, f), lambda i: (i, 0)),
                      pl.BlockSpec((f, h), lambda i: (0, 0))],
            out_specs=pl.BlockSpec((tile, h), lambda i: (i, 0)),
        ),
        compiler_params=pltpu.CompilerParams(
            dimension_semantics=("parallel",),
            vmem_limit_bytes=budget,
        ),
    )(x, w)


def _aggregate(kernel, a_p, m, resident_ops, *, tile_rows, tile_k, m_resident,
               out_dim, out_dtype, acc_cols, budget, extra_flops=0,
               transcendentals=0):
    """Z = A @ M with resident small operands and a per-kernel epilogue."""
    pn_rows, pn_k = a_p.shape
    d_m = m.shape[1]
    row_tiles = pn_rows // tile_rows
    k_tiles = pn_k // tile_k

    if m_resident:
        m_spec = pl.BlockSpec((pn_k, d_m), lambda i, k: (0, 0))   # VMEM-resident
    else:
        m_spec = pl.BlockSpec((tile_k, d_m), lambda i, k: (k, 0))  # stream K-slices

    in_specs = [pl.BlockSpec((tile_rows, tile_k), lambda i, k: (i, k)), m_spec]
    in_specs += [pl.BlockSpec(op.shape, lambda i, k: (0, 0))
                 for op in resident_ops]

    scratch_shapes = []
    if acc_cols:
        scratch_shapes.append(pltpu.VMEM((tile_rows, acc_cols), jnp.float32))

    itemsize = jnp.dtype(out_dtype).itemsize
    m_reads = 1 if m_resident else row_tiles
    cost = pl.CostEstimate(
        flops=int(2 * pn_rows * pn_k * d_m + extra_flops),
        transcendentals=int(transcendentals),
        bytes_accessed=int(a_p.size * a_p.dtype.itemsize
                           + m_reads * m.size * m.dtype.itemsize
                           + pn_rows * out_dim * itemsize
                           + sum(o.size * o.dtype.itemsize
                                 for o in resident_ops)),
    )

    return pl.pallas_call(
        kernel,
        out_shape=jax.ShapeDtypeStruct((pn_rows, out_dim), out_dtype),
        grid_spec=pltpu.PrefetchScalarGridSpec(
            num_scalar_prefetch=0,
            grid=(row_tiles, k_tiles),
            in_specs=in_specs,
            out_specs=pl.BlockSpec((tile_rows, out_dim), lambda i, k: (i, 0)),
            scratch_shapes=scratch_shapes,
        ),
        compiler_params=pltpu.CompilerParams(
            dimension_semantics=("parallel", "arbitrary"),
            vmem_limit_bytes=budget,
        ),
        cost_estimate=cost,
    )(a_p, m, *resident_ops)


# ---------------------------------------------------------------------------
# Forward pass
# ---------------------------------------------------------------------------
def gcn_forward(a_hat, x, w1, b1, w2, b2):
    n, f = x.shape
    hidden = w1.shape[1]
    n_classes = w2.shape[1]

    fp = _round_up(f, LANE)
    hp = _round_up(hidden, LANE)
    cp = _round_up(n_classes, LANE)

    geom = gcn_geometry(n, d_max=max(hp, cp, LANE))
    tile_rows, pn_rows, pn_k = geom["tile_rows"], geom["pn_rows"], geom["pn_k"]
    tile_k, m_resident, budget = (geom["tile_k"], geom["m_resident"],
                                  geom["budget"])

    # Prefer a pre-padded bf16 A_hat (built once outside the forward); pad here
    # only as a fallback (costs an extra pn^2 HBM round-trip per call).
    if a_hat.shape == (pn_rows, pn_k) and a_hat.dtype == jnp.bfloat16:
        a_p = a_hat
    else:
        a_p = jnp.zeros((pn_rows, pn_k), jnp.bfloat16)
        a_p = a_p.at[:n, :n].set(a_hat[:n, :n].astype(jnp.bfloat16))

    x_p = jnp.zeros((pn_k, fp), jnp.bfloat16).at[:n, :f].set(
        x.astype(jnp.bfloat16))
    w1_p = jnp.zeros((fp, hp), jnp.float32).at[:f, :hidden].set(
        w1.astype(jnp.float32))
    b1_p = jnp.zeros((1, hp), jnp.float32).at[0, :hidden].set(
        b1.astype(jnp.float32))
    w2_p = jnp.zeros((hp, cp), jnp.float32).at[:hidden, :n_classes].set(
        w2.astype(jnp.float32))
    b2_p = jnp.zeros((1, cp), jnp.float32).at[0, :n_classes].set(
        b2.astype(jnp.float32))

    # ---- Layer 1 (fused with H @ W2): HW = relu(A @ X W1 + b1) @ W2 --------
    if f <= hidden:
        # Narrow features: contract A over X, apply W1 + fused W2 in finalize.
        hw = _aggregate(
            functools.partial(_l1_fused_xw_kernel, tile_k=tile_k),
            a_p, x_p, (w1_p, b1_p, w2_p),
            tile_rows=tile_rows, tile_k=tile_k, m_resident=m_resident,
            out_dim=cp, out_dtype=jnp.bfloat16, acc_cols=fp, budget=budget,
            extra_flops=2 * pn_rows * (fp * hp + hp * cp))
    else:
        # Wide features (e.g. Cora): precompute X @ W1 once; the N^2 pass then
        # streams only A against the narrow resident XW1.
        xw = _feature_transform(x_p, w1_p.astype(jnp.bfloat16), budget)
        hw = _aggregate(
            functools.partial(_l1_fused_pre_kernel, tile_k=tile_k),
            a_p, xw, (b1_p, w2_p),
            tile_rows=tile_rows, tile_k=tile_k, m_resident=m_resident,
            out_dim=cp, out_dtype=jnp.bfloat16, acc_cols=hp, budget=budget,
            extra_flops=2 * pn_rows * hp * cp)

    # Align HW's row count to A's K padding (tiny bf16 copy; padded rows are
    # multiplied by all-zero A columns, so their values are don't-care).
    if pn_rows >= pn_k:
        hw_m = hw[:pn_k]
    else:
        hw_m = jnp.pad(hw, ((0, pn_k - pn_rows), (0, 0)))

    # ---- Layer 2: out = log_softmax(A @ HW + b2) ----------------------------
    out_p = _aggregate(
        functools.partial(_l2_logsoftmax_kernel, tile_k=tile_k,
                          n_valid_cols=n_classes),
        a_p, hw_m, (b2_p,),
        tile_rows=tile_rows, tile_k=tile_k, m_resident=m_resident,
        out_dim=cp, out_dtype=jnp.float32, acc_cols=0, budget=budget,
        transcendentals=pn_rows * cp)

    return out_p[:n, :n_classes]


# ---------------------------------------------------------------------------
# Graph preprocessing + reference
# ---------------------------------------------------------------------------
def build_normalized_adjacency(edge_index, num_nodes, pad_shape=None):
    """Dense torch_geometric gcn_norm (add_remaining_self_loops semantics),
    bf16, optionally pre-padded to the kernel geometry (build ONCE, outside
    the forward, so the bandwidth-critical A stream is never re-padded)."""
    row, col = edge_index[0], edge_index[1]      # edge j -> i: (row=j, col=i)
    a = jnp.zeros((num_nodes, num_nodes), jnp.float32)
    a = a.at[col, row].add(1.0)                  # duplicate edges accumulate
    # add_remaining_self_loops: only nodes WITHOUT an explicit self-loop get one.
    diag = jnp.diagonal(a)
    a = a + jnp.diag(jnp.where(diag > 0.0, 0.0, 1.0))
    deg = jnp.sum(a, axis=1)
    dinv = jnp.where(deg > 0.0, jax.lax.rsqrt(deg), 0.0)
    # NOTE: bf16 storage loses ~3 significant digits on D^-1/2 vs the f32 ref.
    a = (dinv[:, None] * a * dinv[None, :]).astype(jnp.bfloat16)
    if pad_shape is not None:
        pr, pk = pad_shape
        a = jnp.zeros((pr, pk), jnp.bfloat16).at[:num_nodes, :num_nodes].set(a)
    return a


def gcn_reference(a_hat, x, w1, b1, w2, b2):
    a = a_hat.astype(jnp.float32)
    h = jnp.maximum(a @ (x @ w1) + b1, 0.0)
    z = a @ (h @ w2) + b2
    return jax.nn.log_softmax(z, axis=1)


if __name__ == "__main__":
    key = jax.random.PRNGKey(0)
    k_x, k_e, k_w1, k_b1, k_w2, k_b2 = jax.random.split(key, 6)

    num_nodes = 16
    n_node_features = 8
    hidden = 16          # GCNConv(n_node_features, 16)
    n_classes = 4
    num_edges = 40

    x = jax.random.normal(k_x, (num_nodes, n_node_features), jnp.float32)
    edge_index = jax.random.randint(k_e, (2, num_edges), 0, num_nodes,
                                    dtype=jnp.int32)

    w1 = jax.random.normal(k_w1, (n_node_features, hidden), jnp.float32) * 0.2
    b1 = jax.random.normal(k_b1, (hidden,), jnp.float32) * 0.05
    w2 = jax.random.normal(k_w2, (hidden, n_classes), jnp.float32) * 0.2
    b2 = jax.random.normal(k_b2, (n_classes,), jnp.float32) * 0.05

    # Build A_hat already padded + bf16, once, outside the forward.
    geom = gcn_geometry(num_nodes)
    a_hat = build_normalized_adjacency(
        edge_index, num_nodes, pad_shape=(geom["pn_rows"], geom["pn_k"]))

    out = gcn_forward(a_hat, x, w1, b1, w2, b2)
    out = jax.block_until_ready(out)

    assert out.shape == (num_nodes, n_classes)

    # log_softmax rows must exp-sum to 1 (epilogue runs in f32).
    row_sums = jnp.sum(jnp.exp(out), axis=1)
    assert bool(jnp.all(jnp.abs(row_sums - 1.0) < 1e-3))

    # Compare against pure-JAX reference; bf16 MXU operands => loose tolerance.
    ref = gcn_reference(a_hat[:num_nodes, :num_nodes], x, w1, b1, w2, b2)
    assert bool(jnp.all(jnp.abs(out - ref) < 5e-2))

    print("KERNEL_OK")
</pallas_src>

<mosaic_0001>
module attributes {stable_mosaic.version = 11 : i64} {
  func.func @_l1_fused_xw_kernel(%arg0: i32, %arg1: i32, %arg2: memref<8x128xbf16, #tpu.memory_space<vmem>>, %arg3: memref<128x128xbf16, #tpu.memory_space<vmem>>, %arg4: memref<128x128xf32, #tpu.memory_space<vmem>>, %arg5: memref<1x128xf32, #tpu.memory_space<vmem>>, %arg6: memref<128x128xf32, #tpu.memory_space<vmem>>, %arg7: memref<8x128xbf16, #tpu.memory_space<vmem>>, %arg8: memref<8x128xf32, #tpu.memory_space<vmem>>) attributes {dimension_semantics = [#tpu.dimension_semantics<parallel>, #tpu.dimension_semantics<arbitrary>], iteration_bounds = array<i64: 2, 1>, scalar_prefetch = 0 : i64, scratch_operands = 1 : i64, tpu.core_type = #tpu.core_type<tc>, window_params = [{transform_indices = @transform_0, window_bounds = array<i64: 8, 128>}, {pipeline_mode = #tpu.pipeline_mode<synchronous>, transform_indices = @transform_1, window_bounds = array<i64: 128, 128>}, {pipeline_mode = #tpu.pipeline_mode<synchronous>, transform_indices = @transform_2, window_bounds = array<i64: 128, 128>}, {pipeline_mode = #tpu.pipeline_mode<synchronous>, transform_indices = @transform_3, window_bounds = array<i64: 1, 128>}, {pipeline_mode = #tpu.pipeline_mode<synchronous>, transform_indices = @transform_4, window_bounds = array<i64: 128, 128>}, {transform_indices = @transform_5, window_bounds = array<i64: 8, 128>}]} {
    %c0_i32 = arith.constant 0 : i32
    %0 = arith.cmpi eq, %arg1, %c0_i32 : i32
    %1 = arith.extui %0 : i1 to i32
    %c0_i32_0 = arith.constant 0 : i32
    %2 = arith.cmpi ne, %1, %c0_i32_0 : i32
    scf.if %2 {
      %cst_10 = arith.constant 0.000000e+00 : f32
      %12 = vector.broadcast %cst_10 : f32 to vector<8x128xf32>
      %c0_11 = arith.constant 0 : index
      %c0_12 = arith.constant 0 : index
      %13 = vector.load %arg8[%c0_11, %c0_12] : memref<8x128xf32, #tpu.memory_space<vmem>>, vector<8x128xf32>
      tpu.vector_store %arg8[%c0_11, %c0_12], %12 {strides = array<i32>} : memref<8x128xf32, #tpu.memory_space<vmem>>, vector<8x128xf32>,
    } else {
    }
    %c0 = arith.constant 0 : index
    %c0_1 = arith.constant 0 : index
    %3 = vector.load %arg8[%c0, %c0_1] : memref<8x128xf32, #tpu.memory_space<vmem>>, vector<8x128xf32>
    %c0_2 = arith.constant 0 : index
    %c0_3 = arith.constant 0 : index
    %4 = vector.load %arg2[%c0_2, %c0_3] : memref<8x128xbf16, #tpu.memory_space<vmem>>, vector<8x128xbf16>
    %c0_4 = arith.constant 0 : index
    %c0_5 = arith.constant 0 : index
    %5 = vector.load %arg3[%c0_4, %c0_5] : memref<128x128xbf16, #tpu.memory_space<vmem>>, vector<128x128xbf16>
    %cst = arith.constant dense<0.000000e+00> : vector<8x128xf32>
    %6 = tpu.matmul %4, %5, %cst {dimension_numbers = #tpu.dot_dimension_numbers<[1], [0], [0], [1], [0, 0, 1, 1], [], []>} : vector<8x128xbf16>, vector<128x128xbf16>, vector<8x128xf32> -> vector<8x128xf32>
    %7 = arith.addf %3, %6 : vector<8x128xf32>
    %c0_6 = arith.constant 0 : index
    %c0_7 = arith.constant 0 : index
    %8 = vector.load %arg8[%c0_6, %c0_7] : memref<8x128xf32, #tpu.memory_space<vmem>>, vector<8x128xf32>
    tpu.vector_store %arg8[%c0_6, %c0_7], %7 {strides = array<i32>} : memref<8x128xf32, #tpu.memory_space<vmem>>, vector<8x128xf32>,
    %c0_i32_8 = arith.constant 0 : i32
    %9 = arith.cmpi eq, %arg1, %c0_i32_8 : i32
    %10 = arith.extui %9 : i1 to i32
    %c0_i32_9 = arith.constant 0 : i32
    %11 = arith.cmpi ne, %10, %c0_i32_9 : i32
    scf.if %11 {
      %c0_10 = arith.constant 0 : index
      %c0_11 = arith.constant 0 : index
      %12 = vector.load %arg8[%c0_10, %c0_11] : memref<8x128xf32, #tpu.memory_space<vmem>>, vector<8x128xf32>
      %c0_12 = arith.constant 0 : index
      %c0_13 = arith.constant 0 : index
      %13 = vector.load %arg4[%c0_12, %c0_13] : memref<128x128xf32, #tpu.memory_space<vmem>>, vector<128x128xf32>
      %cst_14 = arith.constant dense<0.000000e+00> : vector<8x128xf32>
      %14 = tpu.matmul %12, %13, %cst_14 {dimension_numbers = #tpu.dot_dimension_numbers<[1], [0], [0], [1], [0, 0, 1, 1], [], []>} : vector<8x128xf32>, vector<128x128xf32>, vector<8x128xf32> -> vector<8x128xf32>
      %c0_15 = arith.constant 0 : index
      %c0_16 = arith.constant 0 : index
      %15 = vector.load %arg5[%c0_15, %c0_16] : memref<1x128xf32, #tpu.memory_space<vmem>>, vector<1x128xf32>
      %16 = vector.broadcast %15 : vector<1x128xf32> to vector<8x128xf32>
      %17 = arith.addf %14, %16 : vector<8x128xf32>
      %cst_17 = arith.constant 0.000000e+00 : f32
      %18 = vector.broadcast %cst_17 : f32 to vector<8x128xf32>
      %19 = arith.maximumf %17, %18 : vector<8x128xf32>
      %c0_18 = arith.constant 0 : index
      %c0_19 = arith.constant 0 : index
      %20 = vector.load %arg6[%c0_18, %c0_19] : memref<128x128xf32, #tpu.memory_space<vmem>>, vector<128x128xf32>
      %cst_20 = arith.constant dense<0.000000e+00> : vector<8x128xf32>
      %21 = tpu.matmul %19, %20, %cst_20 {dimension_numbers = #tpu.dot_dimension_numbers<[1], [0], [0], [1], [0, 0, 1, 1], [], []>} : vector<8x128xf32>, vector<128x128xf32>, vector<8x128xf32> -> vector<8x128xf32>
      %22 = arith.truncf %21 : vector<8x128xf32> to vector<8x128xbf16>
      %c0_21 = arith.constant 0 : index
      %c0_22 = arith.constant 0 : index
      %23 = vector.load %arg7[%c0_21, %c0_22] : memref<8x128xbf16, #tpu.memory_space<vmem>>, vector<8x128xbf16>
      tpu.vector_store %arg7[%c0_21, %c0_22], %22 {strides = array<i32>} : memref<8x128xbf16, #tpu.memory_space<vmem>>, vector<8x128xbf16>,
    } else {
    }
    return
  }
  func.func @transform_0(%arg0: i32, %arg1: i32) -> (i32, i32) {
    %c0_i32 = arith.constant 0 : i32
    return %arg0, %arg1 : i32, i32
  }
  func.func @transform_1(%arg0: i32, %arg1: i32) -> (i32, i32) {
    %c0_i32 = arith.constant 0 : i32
    %c0_i32_0 = arith.constant 0 : i32
    %c0_i32_1 = arith.constant 0 : i32
    return %c0_i32, %c0_i32_0 : i32, i32
  }
  func.func @transform_2(%arg0: i32, %arg1: i32) -> (i32, i32) {
    %c0_i32 = arith.constant 0 : i32
    %c0_i32_0 = arith.constant 0 : i32
    %c0_i32_1 = arith.constant 0 : i32
    return %c0_i32, %c0_i32_0 : i32, i32
  }
  func.func @transform_3(%arg0: i32, %arg1: i32) -> (i32, i32) {
    %c0_i32 = arith.constant 0 : i32
    %c0_i32_0 = arith.constant 0 : i32
    %c0_i32_1 = arith.constant 0 : i32
    return %c0_i32, %c0_i32_0 : i32, i32
  }
  func.func @transform_4(%arg0: i32, %arg1: i32) -> (i32, i32) {
    %c0_i32 = arith.constant 0 : i32
    %c0_i32_0 = arith.constant 0 : i32
    %c0_i32_1 = arith.constant 0 : i32
    return %c0_i32, %c0_i32_0 : i32, i32
  }
  func.func @transform_5(%arg0: i32, %arg1: i32) -> (i32, i32) {
    %c0_i32 = arith.constant 0 : i32
    %c0_i32_0 = arith.constant 0 : i32
    return %arg0, %c0_i32 : i32, i32
  }
}

</mosaic_0001>

<bundles_post_ra>
// kernel: tpu_custom_call.1
= control target key start
LH: loop header
LB: loop body
LE: loop exit
PB: predicated region body
PF: predicated region fallthrough
CT: control target
= control target key end

     0   :  { %10 = vsyncpa [#allocation4], 0  ;;  %s1183_s0 = inlined_call_operand.hbm [shape: bf16[16,128], index: 0, kind: input, shape index: {}]   ;;  %s1184_s1 = inlined_call_operand.hbm [shape: bf16[128,128], index: 1, kind: input, shape index: {}]   ;;  %s1185_s2 = inlined_call_operand.hbm [shape: f32[128,128], index: 2, kind: input, shape index: {}]   ;;  %s1186_s3 = inlined_call_operand.vmem [shape: f32[1,128], index: 3, kind: input, shape index: {}]   ;;  %s1187_s4 = inlined_call_operand.hbm [shape: f32[128,128], index: 4, kind: input, shape index: {}]   ;;  %s1188_s5 = inlined_call_operand.hbm [shape: bf16[16,128], index: 5, kind: output, shape index: {}]  }
   0x1   :  { %12 = vsyncpa [#allocation4 + $0x1], 0 }
   0x2   :  { %13 = vsyncpa [#allocation7], 0 }
   0x3   :  { %14 = vsyncpa [#allocation10], 0 }
   0x4   :  { %15 = vsyncpa [#allocation5], 0 }
   0x5   :  { %17 = vsyncpa [#allocation5 + $0x1], 0  ;;  %s1006_s18 = smov 0   ;;  %s1008_s19 = smov 0  }
   0x6   :  { %s1010_s20 = smov 0   ;;  %s1012_s21 = smov 0  }
   0x7   :  { %s1014_s22 = smov 0   ;;  %s1016_s23 = smov 0  }
   0x8 LB: > { %s600_s24 = sadd.s32 4294967295, %s967_s23   ;;  %p602_p0 = scmp.ge.s32.totalorder %s967_s23, 1  ;;  %s967_s23 = sphi %s1016_s23, %s23_s23   ;;  %s963_s22 = sphi %s1014_s22, %s1200_s22   ;;  %s959_s21 = sphi %s1012_s21, %s1199_s21   ;;  %s955_s20 = sphi %s1010_s20, %s1198_s20   ;;  %s951_s19 = sphi %s1008_s19, %s1197_s19   ;;  %s947_s18 = sphi %s1006_s18, %s1196_s18  }
   0x9   : > { %p1040_p1 = scmp.eq.s32.totalorder %s600_s24, 0  ;;  %p178_p2 = scmp.lt.s32.totalorder %s967_s23, 3 }
   0xa   : > { %s189_s28 = sshll.u32 %s1184_s1, 4  ;;  %s969_s30 = smov [#allocation6]   ;;  %s190_s28 = int_to_ptr.hbm [resolvable:$true] %s189_s28 }
   0xb   : > { %p1048_p3 = pnand %p602_p0, %p178_p2  ;;  %s191_s6 = sshll.u32 %s969_s30, 4  ;;  %s192_s6 = int_to_ptr.vmem [resolvable:$true] %s191_s6 }
   0xc   : > { %p606_p6 = scmp.ge.s32.totalorder %s967_s23, 2  ;;  %s203_s10 = sshll.u32 %s1185_s2, 4  ;;  %s204_s10 = int_to_ptr.hbm [resolvable:$true] %s203_s10 }
   0xd   : > { %p675_p4 = pneg %p1048_p3  ;;  %s970_s11 = smov 64  }
   0xe   : > { %s971_s12 = smov 4   ;;  %s972_s13 = smov [#allocation8]  }
   0xf   : > { %p1056_p5 = pnand %p675_p4, %p1040_p1  ;;  %s205_s14 = sshll.u32 %s972_s13, 4  ;;  %s206_s14 = int_to_ptr.vmem [resolvable:$true] %s205_s14 }
  0x10   : > { %s973_s15 = smov 128   ;;  %s974_s16 = smov 8  }
  0x11   : > { %678 = dma.hbm_to_vmem [thread:$0]  (!%p1056_p5), %s190_s28, 1024, %s192_s6, [#allocation7], %s970_s11, %s970_s11, %s971_s12  }
  0x12   : > { %681 = dma.hbm_to_vmem [thread:$0]  (!%p1056_p5), %s204_s10, 2048, %s206_s14, [#allocation7], %s973_s15, %s973_s15, %s974_s16  }
  0x13   : > { %s220_s27 = sshll.u32 %s1187_s4, 4  ;;  %s975_s28 = smov [#allocation9]   ;;  %s221_s27 = int_to_ptr.hbm [resolvable:$true] %s220_s27 }
  0x14   : > { %s222_s30 = sshll.u32 %s975_s28, 4  ;;  %s601_s6 = sadd.s32 4294967294, %s967_s23   ;;  %s223_s30 = int_to_ptr.vmem [resolvable:$true] %s222_s30 }
  0x15   : > { %684 = dma.hbm_to_vmem [thread:$0]  (!%p1056_p5), %s221_s27, 2048, %s223_s30, [#allocation10], %s973_s15, %s973_s15, %s974_s16  }
  0x16   : > { %s35_s8 = sadd.s32 1, %s963_s22  ;;  %s44_s9 = sadd.s32 1, %s955_s20 }
  0x17   : > { %p37_p7 = scmp.ge.s32.totalorder %s35_s8, 2  ;;  %p51_p8 = scmp.ne.s32.totalorder %s955_s20, %s951_s19 }
  0x18   : > { %p52_p9 = scmp.eq.s32.totalorder %s967_s23, 0  ;;  %p57_p10 = scmp.ne.s32.totalorder %s951_s19, %s947_s18 }
  0x19   : > { %s1202_s8 = smov (%p37_p7, %s35_s8), 0  ;;  %p165_p13 = scmp.eq.s32.totalorder %s600_s24, 1 }
  0x1a   : > { %p1083_p11 = por %p52_p9, %p51_p8  ;;  %p1089_p12 = por %p1040_p1, %p57_p10 }
  0x1b   : > { %s39_s11 = ssub.s32 %s963_s22, %s1202_s8  ;;  %p171_p2 = scmp.eq.s32.totalorder %s601_s6, 1 }
  0x1c   : > { %p42_p0 = scmp.eq.s32.totalorder %s39_s11, 0  ;;  %p1097_p4 = por %p165_p13, %p51_p8 }
  0x1d   : > { %p696_p5 = scmp.lt.s32.totalorder %s967_s23, 2  ;;  %p1105_p7 = por %p171_p2, %p57_p10 }
  0x1e   : > { %s1103_s13 = scalar_select %p42_p0, %s955_s20, %s44_s9  }
  0x1f   : > { %s236_s15 = sand.u32 1, %s955_s20   ;;  %s608_s17 = sshll.u32 %s963_s22, 2 }
  0x20   : > { %s607_s16 = sshll.u32 %s236_s15, 2  ;;  %s245_s24 = scalar_lea.hbm %s1183_s0, %s608_s17 }
  0x21   : > { %s240_s28 = scalar_lea.vmem [#allocation3], %s607_s16  ;;  %s247_s6 = sshll.u32 %s245_s24, 4  ;;  %s248_s6 = int_to_ptr.hbm [resolvable:$true] %s247_s6 }
  0x22   : > { %s249_s30 = sshll.u32 %s240_s28, 4  ;;  %p686_p8 = pnand %p696_p5, %p1083_p11  ;;  %s250_s30 = int_to_ptr.vmem [resolvable:$true] %s249_s30 }
  0x23   : > { %s237_s9 = scalar_lea.sflag [#allocation4], %s236_s15  ;;  %258 = sbr.rel (%p1048_p3) target bundleno = 470 (0x1d6), region = 40 }
  0x24   : > { %688 = dma.hbm_to_vmem [thread:$0]  (!%p686_p8), %s248_s6, 64, %s250_s30, %s237_s9  }
  0x25   : > { %s1119_s11 = sand.u32 (!%p1048_p3), 1, %s951_s19  }
  0x26   : > { %s610_s17 = sshll.u32 (!%p1048_p3), %s1119_s11, 2  ;;  %s261_s16 = scalar_lea.sflag (!%p1048_p3), [#allocation4], %s1119_s11 }
  0x27   : > { %s1125_s26 = scalar_lea.vmem (!%p1048_p3), [#allocation3], %s610_s17 }
  0x28   : > { %930 = dma.done.wait (%p1089_p12), %s261_s16, 64  }
  0x29   : > { %932 = vsyncadd (%p1089_p12), %s261_s16, 4294967232 }
  0x2a   : > { %934 = dma.done.wait (%p1040_p1), [#allocation7], 3072  }
  0x2b   : > { %936 = vsyncadd (%p1040_p1), [#allocation7], 4294964224 }
  0x2c   : > { %938 = dma.done.wait (%p1040_p1), [#allocation10], 2048  }
  0x2d   : > { %940 = vsyncadd (%p1040_p1), [#allocation10], 4294965248  ;;  %v658_v0 = vld [vmem:[#allocation6 + $0x38] sm:$0xff]  ;;  %v657_v1 = vld [vmem:[#allocation6 + $0x30] sm:$0xff]  ;;  %s648_s10 = sshll.u32 %s959_s21, 2  ;;  %s306_s24 = scalar_lea.vmem [#allocation11], %s610_s17 }
  0x2e   : > { %378 = vmatpush.bf16.msra.mxu0 %v658_v0  ;;  %v412_v2 = vld [vmem:[#allocation8 + $0x78] sm:$0xff]  ;;  %v411_v3 = vld [vmem:[#allocation8 + $0x70] sm:$0xff]  ;;  %v410_v4 = vld [vmem:[#allocation8 + $0x68] sm:$0xff]  ;;  %s487_s27 = scalar_lea.hbm %s1188_s5, %s648_s10  ;;  %s489_s28 = sshll.u32 %s306_s24, 4  ;;  %s490_s28 = int_to_ptr.vmem [resolvable:$true] %s489_s28 }
  0x2f   : > { %417 = vmatpush.msra.mxu1 %v412_v2  ;;  %v656_v5 = vld [vmem:[#allocation6 + $0x28] sm:$0xff]  ;;  %v409_v6 = vld [vmem:[#allocation8 + $0x60] sm:$0xff]  ;;  %v408_v7 = vld [vmem:[#allocation8 + $0x58] sm:$0xff]  ;;  %s491_s30 = sshll.u32 %s487_s27, 4  ;;  %s477_s6 = scalar_lea.sflag [#allocation5], %s1119_s11  ;;  %s492_s30 = int_to_ptr.hbm [resolvable:$true] %s491_s30 }
  0x30   : > { %v655_v8 = vld [vmem:[#allocation6 + $0x20] sm:$0xff]  ;;  %v407_v9 = vld [vmem:[#allocation8 + $0x50] sm:$0xff]  ;;  %v406_v10 = vld [vmem:[#allocation8 + $0x48] sm:$0xff]  ;;  %s891_s9 = sshra.s32 %s492_s30, 4  ;;  %s897_s25 = scalar_lea.hbm %s1188_s5, 8  ;;  %s892_s9 = int_to_ptr.hbm [resolvable:$true] %s891_s9 }
  0x31   : > { %418 = vmatpush.msra.mxu1 %v411_v3  ;;  %v654_v11 = vld [vmem:[#allocation6 + $0x18] sm:$0xff]  ;;  %v405_v12 = vld [vmem:[#allocation8 + $0x40] sm:$0xff]  ;;  %v653_v14 = vld [vmem:[#allocation6 + $0x10] sm:$0xff]  ;;  %s893_s16 = scalar_lea.hbm %s892_s9, 4  ;;  %p898_p10 = scmp.lt.s32.totalorder %s892_s9, %s1188_s5 }
  0x32   : > { %379 = vmatpush.bf16.msra.mxu0 %v657_v1  ;;  %v404_v13 = vld [vmem:[#allocation8 + $0x38] sm:$0xff]  ;;  %v403_v15 = vld [vmem:[#allocation8 + $0x30] sm:$0xff]  ;;  %v402_v16 = vld [vmem:[#allocation8 + $0x28] sm:$0xff]  ;;  %p894_p1 = scmp.ne.s32.totalorder %s892_s9, %s893_s16  ;;  %p899_p11 = scmp.lt.s32.totalorder %s897_s25, %s893_s16 }
  0x33   : > { %419 = vmatpush.msra.mxu1 %v410_v4  ;;  %v652_v17 = vld [vmem:[#allocation6 + $0x8] sm:$0xff]  ;;  %v401_v18 = vld [vmem:[#allocation8 + $0x20] sm:$0xff]  ;;  %v400_v19 = vld [vmem:[#allocation8 + $0x18] sm:$0xff] }
  0x34   : > { %v651_v20 = vld [vmem:[#allocation6] sm:$0xff]  ;;  %v399_v21 = vld [vmem:[#allocation8 + $0x10] sm:$0xff]  ;;  %v398_v22 = vld [vmem:[#allocation8 + $0x8] sm:$0xff]  ;;  %p895_p3 = pnand %p894_p1, %p1097_p4  ;;  %p900_p12 = por %p899_p11, %p898_p10 }
  0x35   : > { %420 = vmatpush.msra.mxu1 %v409_v6  ;;  %v313_v23 = vld [vmem:[%s1125_s26] sm:$0xf]  ;;  %v397_v24 = vld [vmem:[#allocation8] sm:$0xff]  ;;  %v452_v26 = vld [vmem:[#allocation9 + $0x70] sm:$0xff] }
  0x36   : > { %380 = vmatpush.bf16.msra.mxu0 %v656_v5  ;;  %v453_v25 = vld [vmem:[#allocation9 + $0x78] sm:$0xff]  ;;  %v451_v27 = vld [vmem:[#allocation9 + $0x68] sm:$0xff]  ;;  %v450_v28 = vld [vmem:[#allocation9 + $0x60] sm:$0xff]  ;;  %p896_p9 = pneg %p895_p3 }
  0x37   : > { %421 = vmatpush.msra.mxu1 %v408_v7  ;;  %454 = vmatpush.msra.mxu2 %v453_v25  ;;  %v449_v29 = vld [vmem:[#allocation9 + $0x58] sm:$0xff]  ;;  %v448_v30 = vld [vmem:[#allocation9 + $0x50] sm:$0xff]  ;;  %v447_v31 = vld [vmem:[#allocation9 + $0x48] sm:$0xff] }
  0x38   : > { %v446_v32 = vld [vmem:[#allocation9 + $0x40] sm:$0xff]  ;;  %v445_v33 = vld [vmem:[#allocation9 + $0x38] sm:$0xff]  ;;  %v444_v34 = vld [vmem:[#allocation9 + $0x30] sm:$0xff]  ;;  %p901_p13 = pnand %p900_p12, %p896_p9 }
  0x39   : > { %422 = vmatpush.msra.mxu1 %v407_v9  ;;  %455 = vmatpush.msra.mxu2 %v452_v26  ;;  %v443_v35 = vld [vmem:[#allocation9 + $0x28] sm:$0xff]  ;;  %v442_v36 = vld [vmem:[#allocation9 + $0x20] sm:$0xff]  ;;  %v441_v37 = vld [vmem:[#allocation9 + $0x18] sm:$0xff] }
  0x3a   : > { %381 = vmatpush.bf16.msra.mxu0 %v655_v8  ;;  %v440_v40 = vld [vmem:[#allocation9 + $0x10] sm:$0xff]  ;;  %v439_v41 = vld [vmem:[#allocation9 + $0x8] sm:$0xff]  ;;  %v438_v42 = vld [vmem:[#allocation9] sm:$0xff] }
  0x3b   : > { %423 = vmatpush.msra.mxu1 %v406_v10  ;;  %456 = vmatpush.msra.mxu2 %v451_v27  ;;  %v756_v43 = vld [vmem:[%s1186_s3] ss:$0 sm:$0xff] }
  0x3d   : > { %424 = vmatpush.msra.mxu1 %v405_v12  ;;  %457 = vmatpush.msra.mxu2 %v450_v28 }
  0x3e   : > { %382 = vmatpush.bf16.msra.mxu0 %v654_v11 }
  0x3f   : > { %425 = vmatpush.msra.mxu1 %v404_v13  ;;  %458 = vmatpush.msra.mxu2 %v449_v29 }
  0x41   : > { %426 = vmatpush.msra.mxu1 %v403_v15  ;;  %459 = vmatpush.msra.mxu2 %v448_v30 }
  0x42   : > { %383 = vmatpush.bf16.msra.mxu0 %v653_v14 }
  0x43   : > { %427 = vmatpush.msra.mxu1 %v402_v16  ;;  %460 = vmatpush.msra.mxu2 %v447_v31 }
  0x45   : > { %428 = vmatpush.msra.mxu1 %v401_v18  ;;  %461 = vmatpush.msra.mxu2 %v446_v32 }
  0x46   : > { %384 = vmatpush.bf16.msra.mxu0 %v652_v17 }
  0x47   : > { %429 = vmatpush.msra.mxu1 %v400_v19  ;;  %462 = vmatpush.msra.mxu2 %v445_v33 }
  0x49   : > { %430 = vmatpush.msra.mxu1 %v399_v21  ;;  %463 = vmatpush.msra.mxu2 %v444_v34 }
  0x4a   : > { %385 = vmatpush.bf16.msra.mxu0 %v651_v20 }
  0x4b   : > { %431 = vmatpush.msra.mxu1 %v398_v22  ;;  %464 = vmatpush.msra.mxu2 %v443_v35 }
  0x4d   : > { %386 = vmatmul.bf16.vlgmr.msra.gmra.mxu0 %v313_v23  ;;  %432 = vmatpush.msra.mxu1 %v397_v24 }
  0x4e   : > { %465 = vmatpush.msra.mxu2 %v442_v36 }
  0x50   : > { %466 = vmatpush.msra.mxu2 %v441_v37 }
  0x52   : > { %467 = vmatpush.msra.mxu2 %v440_v40 }
  0x54   : > { %468 = vmatpush.msra.mxu2 %v439_v41 }
  0x56   : > { %469 = vmatpush.msra.mxu2 %v438_v42 }
  0xca   : > { %v387_v38 = vpop.f32.mrf.mxu0 }
  0xcb   : > { %433 = vmatmul.f32.vlgmr.msra.gmra.mxu1 %v387_v38 }
  0xd2   : > { %v389_v39 = vpop.f32.mrf.mxu0 }
 0x148   : > { %v434_v44 = vpop.f32.mrf.mxu1 }
 0x149   : > { %v435_v45 = vadd.f32 %v756_v43, %v434_v44 }
 0x14b   : > { %v437_v46 = vmax.f32 %v435_v45, 0.0 }
 0x14d   : > { %470 = vmatmul.f32.vlgmr.msra.gmra.mxu2 %v437_v46 }
 0x1d0   : > { %v471_v47 = vpop.f32.mrf.mxu2 }
 0x1d1   : > { %v474_v48 = vpack.c.bf16 %v471_v47, %v471_v47 }
 0x1d3   : > { %475 = vst [vmem:[%s306_s24] sm:$0xf] %v474_v48 }
 0x1d4   : > { %904 = shalt.err (!%p901_p13)
}
 0x1d5   : > { %673 = dma.vmem_to_hbm [thread:$0]  (%p1097_p4), %s490_s28, 64, %s492_s30, %s477_s6  }
 0x1d6 PF: > { %s503_s11 = sand.u32 1, %s947_s18   ;;  %p690_p0 = pnand %p606_p6, %p1105_p7 }
 0x1d7   : > { %s504_s10 = scalar_lea.sflag [#allocation5], %s503_s11 }
 0x1d8   : > { %p691_p2 = pneg %p690_p0 }
 0x1da   : > { %942 = dma.done.wait (%p691_p2), %s504_s10, 64  }
 0x1db   : > { %944 = vsyncadd (%p691_p2), %s504_s10, 4294967232  ;;  %s23_s23 = sadd.s32 1, %s967_s23   ;;  %s1196_s18 = smov %s951_s19 }
 0x1dc   : > { %p20_p5 = scmp.ge.s32.totalorder %s23_s23, 4   ;;  %s1197_s19 = smov %s955_s20 }
 0x1dd   : > { %s1198_s20 = smov %s1103_s13  ;;  %s1199_s21 = smov %s963_s22 }
 0x1de   : > { %s1200_s22 = smov %s1202_s8  ;;  %22 = sbr.rel (!%p20_p5) target bundleno = 8 (0x8), region = 105 }
 0x1e3   :  { %510 = vsyncpa [#allocation4], 1 }
 0x1e4   :  { %512 = vsyncpa [#allocation4 + $0x1], 1 }
 0x1e5   :  { %513 = vsyncpa [#allocation7], 1 }
 0x1e6   :  { %514 = vsyncpa [#allocation10], 1 }
 0x1e7   :  { %515 = vsyncpa [#allocation5], 1 }
 0x1e8   :  { %517 = vsyncpa [#allocation5 + $0x1], 1 }

</bundles_post_ra>
